<compile_context>
chip_gen: v7x
topology: tpu7x:2x2x1
jax: 0.10.0
libtpu: 0.0.40
codegen_flags: <defaults>
</compile_context>

<pallas_src>
import jax
import jax.numpy as jnp
from jax.experimental import pallas as pl
from jax.experimental.pallas import tpu as pltpu


def _round_up(x, m):
    return (x + m - 1) // m * m


def word2vec_decode_kernel(emb_ref, dec_ref, out_ref):
    """One vocab tile of logits.

    emb_ref : VMEM (B_pad, D_aug)   gathered embeddings; column D is 1.0
    dec_ref : VMEM (D_aug, TILE_V)  decoder weights^T with bias folded in row D
    out_ref : VMEM (B_pad, TILE_V)  f32 logits tile
    """
    out_ref[...] = jnp.dot(
        emb_ref[...], dec_ref[...], preferred_element_type=jnp.float32
    ).astype(out_ref.dtype)


def prepare_word2vec_params(enc_w, dec_w, dec_b, *,
                            param_dtype=jnp.bfloat16, tile_v=8192):
    """One-time padding / layout of the Word2Vec parameters.

    enc_w: [V, D] embedding table, dec_w: [V, D] linear weight, dec_b: [V].
    Returns a dict of padded, kernel-ready arrays plus layout metadata.
    """
    V, D = enc_w.shape
    D_aug = _round_up(D + 1, 8)                  # D weight rows + 1 bias row, sublane pad
    tile_v = min(tile_v, _round_up(V, 128))      # lane-dense vocab tile
    V_pad = _round_up(V, tile_v)

    # Embedding table augmented with a constant-1 column that feeds the folded
    # bias row of the decoder.
    enc_aug = jnp.zeros((V, D_aug), param_dtype)
    enc_aug = enc_aug.at[:, :D].set(enc_w.astype(param_dtype))
    enc_aug = enc_aug.at[:, D].set(1.0)

    # Decoder pre-transposed to (D_aug, V_pad): rows 0..D-1 = dec_w.T,
    # row D = dec_b, remaining rows zero.  Padded vocab columns stay zero and
    # are sliced off after the kernel.
    dec_aug = jnp.zeros((D_aug, V_pad), param_dtype)
    dec_aug = dec_aug.at[:D, :V].set(dec_w.T.astype(param_dtype))
    dec_aug = dec_aug.at[D, :V].set(dec_b.astype(param_dtype))

    return {"enc_aug": enc_aug, "dec_aug": dec_aug,
            "n_vocab": V, "embed_dim": D, "tile_v": tile_v}


def word2vec_forward(idx, params):
    """idx: [B] int token ids -> logits [B, V] float32 (== dec(enc(idx)))."""
    enc_aug = params["enc_aug"]
    dec_aug = params["dec_aug"]
    V = params["n_vocab"]
    tile_v = params["tile_v"]
    D_aug = enc_aug.shape[1]
    V_pad = dec_aug.shape[1]

    B = idx.shape[0]
    B_pad = _round_up(B, 8)

    # Gather in JAX (hoisted out of the kernel); clamp so padded / bad ids can
    # never index past the table (semantic deviation from nn.Embedding, which
    # raises on out-of-range ids).
    idx = jnp.clip(idx.astype(jnp.int32), 0, V - 1)
    emb = jnp.zeros((B_pad, D_aug), enc_aug.dtype).at[:B].set(enc_aug[idx])

    grid = (V_pad // tile_v,)
    itemsize = jnp.dtype(enc_aug.dtype).itemsize
    cost = pl.CostEstimate(
        flops=2 * B_pad * D_aug * V_pad,
        transcendentals=0,
        bytes_accessed=(D_aug * V_pad * itemsize      # streamed decoder
                        + B_pad * D_aug * itemsize    # resident embeddings
                        + B_pad * V_pad * 4))         # f32 logits out

    out_padded = pl.pallas_call(
        word2vec_decode_kernel,
        out_shape=jax.ShapeDtypeStruct((B_pad, V_pad), jnp.float32),
        grid_spec=pltpu.PrefetchScalarGridSpec(
            num_scalar_prefetch=0,
            grid=grid,
            in_specs=[
                # Gathered embeddings: constant index map -> DMA'd once,
                # resident across all vocab tiles (tiny: B_pad x D_aug).
                pl.BlockSpec((B_pad, D_aug), lambda j: (0, 0)),
                # Decoder streamed one lane-dense vocab tile per grid step
                # (auto double-buffered).
                pl.BlockSpec((D_aug, tile_v), lambda j: (0, j)),
            ],
            out_specs=pl.BlockSpec((B_pad, tile_v), lambda j: (0, j)),
        ),
        compiler_params=pltpu.CompilerParams(
            dimension_semantics=("parallel",)),
        cost_estimate=cost,
    )(emb, dec_aug)

    return out_padded[:B, :V]


def reference_forward(idx, enc_w, dec_w, dec_b):
    emb = enc_w[idx]                 # nn.Embedding
    return emb @ dec_w.T + dec_b     # nn.Linear


if __name__ == "__main__":
    EMBEDDING_DIM = 2
    N_CORPUS_WORDS = 32   # synthetic preprocessor vocab size
    BATCH = 8

    key = jax.random.PRNGKey(0)
    k_enc, k_decw, k_decb, k_idx = jax.random.split(key, 4)

    # Torch-like init: Embedding ~ N(0,1), Linear W/b ~ U(+-1/sqrt(fan_in)).
    enc_w = jax.random.normal(k_enc, (N_CORPUS_WORDS, EMBEDDING_DIM), jnp.float32)
    bound = EMBEDDING_DIM ** -0.5
    dec_w = jax.random.uniform(
        k_decw, (N_CORPUS_WORDS, EMBEDDING_DIM), jnp.float32, -bound, bound)
    dec_b = jax.random.uniform(
        k_decb, (N_CORPUS_WORDS,), jnp.float32, -bound, bound)
    idx = jax.random.randint(k_idx, (BATCH,), 0, N_CORPUS_WORDS, jnp.int32)

    # Parameters padded / laid out once (bf16 stream, f32 MXU accumulate).
    params = prepare_word2vec_params(enc_w, dec_w, dec_b)

    out = jax.block_until_ready(word2vec_forward(idx, params))
    assert out.shape == (BATCH, N_CORPUS_WORDS)
    assert out.dtype == jnp.float32

    # Reference built from bf16-rounded parameters: the kernel's only precision
    # loss is the bf16 rounding of the streamed operands (accumulation is f32),
    # so this comparison is tight.  param_dtype=jnp.float32 in
    # prepare_word2vec_params reproduces the exact f32 forward of the module.
    bf = lambda a: a.astype(jnp.bfloat16).astype(jnp.float32)
    ref = reference_forward(idx, bf(enc_w), bf(dec_w), bf(dec_b))
    assert jnp.allclose(out, ref, atol=1e-3, rtol=1e-3), "mismatch vs reference"

    print("KERNEL_OK")
</pallas_src>

<mosaic_0001>
module attributes {stable_mosaic.version = 11 : i64} {
  func.func @word2vec_decode_kernel(%arg0: i32, %arg1: memref<8x8xbf16, #tpu.memory_space<vmem>>, %arg2: memref<8x128xbf16, #tpu.memory_space<vmem>>, %arg3: memref<8x128xf32, #tpu.memory_space<vmem>>) attributes {dimension_semantics = [#tpu.dimension_semantics<parallel>], iteration_bounds = array<i64: 1>, scalar_prefetch = 0 : i64, scratch_operands = 0 : i64, tpu.core_type = #tpu.core_type<tc>, window_params = [{pipeline_mode = #tpu.pipeline_mode<synchronous>, transform_indices = @transform_0, window_bounds = array<i64: 8, 8>}, {transform_indices = @transform_1, window_bounds = array<i64: 8, 128>}, {transform_indices = @transform_2, window_bounds = array<i64: 8, 128>}]} {
    %c0 = arith.constant 0 : index
    %c0_0 = arith.constant 0 : index
    %0 = vector.load %arg1[%c0, %c0_0] : memref<8x8xbf16, #tpu.memory_space<vmem>>, vector<8x8xbf16>
    %c0_1 = arith.constant 0 : index
    %c0_2 = arith.constant 0 : index
    %1 = vector.load %arg2[%c0_1, %c0_2] : memref<8x128xbf16, #tpu.memory_space<vmem>>, vector<8x128xbf16>
    %cst = arith.constant dense<0.000000e+00> : vector<8x128xf32>
    %2 = tpu.matmul %0, %1, %cst {dimension_numbers = #tpu.dot_dimension_numbers<[1], [0], [0], [1], [0, 0, 1, 1], [], []>} : vector<8x8xbf16>, vector<8x128xbf16>, vector<8x128xf32> -> vector<8x128xf32>
    %c0_3 = arith.constant 0 : index
    %c0_4 = arith.constant 0 : index
    %3 = vector.load %arg3[%c0_3, %c0_4] : memref<8x128xf32, #tpu.memory_space<vmem>>, vector<8x128xf32>
    tpu.vector_store %arg3[%c0_3, %c0_4], %2 {strides = array<i32>} : memref<8x128xf32, #tpu.memory_space<vmem>>, vector<8x128xf32>,
    return
  }
  func.func @transform_0(%arg0: i32) -> (i32, i32) {
    %c0_i32 = arith.constant 0 : i32
    %c0_i32_0 = arith.constant 0 : i32
    %c0_i32_1 = arith.constant 0 : i32
    return %c0_i32, %c0_i32_0 : i32, i32
  }
  func.func @transform_1(%arg0: i32) -> (i32, i32) {
    %c0_i32 = arith.constant 0 : i32
    %c0_i32_0 = arith.constant 0 : i32
    return %c0_i32, %arg0 : i32, i32
  }
  func.func @transform_2(%arg0: i32) -> (i32, i32) {
    %c0_i32 = arith.constant 0 : i32
    %c0_i32_0 = arith.constant 0 : i32
    return %c0_i32, %arg0 : i32, i32
  }
}

</mosaic_0001>

<bundles_post_ra>
// kernel: tpu_custom_call.1
= control target key start
LH: loop header
LB: loop body
LE: loop exit
PB: predicated region body
PF: predicated region fallthrough
CT: control target
= control target key end

     0   :  { %7 = vsyncpa [#allocation3], 0  ;;  %s246_s0 = inlined_call_operand.hbm [shape: bf16[8,8], index: 0, kind: input, shape index: {}]   ;;  %s247_s1 = inlined_call_operand.hbm [shape: bf16[8,128], index: 1, kind: input, shape index: {}]   ;;  %s248_s2 = inlined_call_operand.hbm [shape: f32[8,128], index: 2, kind: output, shape index: {}]  }
   0x1   :  { %8 = vsyncpa [#allocation6], 0 }
   0x2   :  { %9 = vsyncpa [#allocation4], 0  ;;  %s190_s9 = smov [#allocation2]   ;;  %s191_s11 = smov [#allocation5]  }
   0x3   :  { %s16_s10 = sshll.u32 %s190_s9, 4  ;;  %s26_s12 = sshll.u32 %s191_s11, 4  ;;  %s17_s10 = int_to_ptr.vmem [resolvable:$true] %s16_s10  ;;  %s27_s12 = int_to_ptr.vmem [resolvable:$true] %s26_s12 }
   0x4   :  { %s118_s15 = scalar_lea.hbm %s246_s0, 64 }
   0x5   :  { %p119_p0 = scmp.ne.s32.totalorder %s246_s0, %s118_s15  ;;  %p122_p1 = scmp.lt.u32.totalorder %s118_s15, %s246_s0 }
   0x7   :  { %p124_p2 = pnand %p122_p1, %p119_p0 }
   0x9   :  { %127 = shalt.err (!%p124_p2)
}
   0xa   :  { %s128_s20 = scalar_lea.vmem %s17_s10, 64  ;;  %p133_p4 = scmp.lt.s32.totalorder %s17_s10, %s17_s10 }
   0xb   :  { %p129_p3 = scmp.ne.s32.totalorder %s17_s10, %s128_s20  ;;  %p134_p5 = scmp.lt.s32.totalorder %s128_s20, %s128_s20 }
   0xd   :  { %p135_p6 = por %p134_p5, %p133_p4 }
   0xf   :  { %p136_p7 = pnand %p135_p6, %p129_p3 }
  0x11   :  { %139 = shalt.err (!%p136_p7)
}
  0x12   :  { %19 = dma.hbm_to_vmem [thread:$0]  %s246_s0, 64, %s17_s10, [#allocation3]  }
  0x13   :  { %s140_s25 = scalar_lea.hbm %s247_s1, 64 }
  0x14   :  { %p141_p8 = scmp.ne.s32.totalorder %s247_s1, %s140_s25  ;;  %p144_p9 = scmp.lt.u32.totalorder %s140_s25, %s247_s1 }
  0x16   :  { %p146_p10 = pnand %p144_p9, %p141_p8 }
  0x18   :  { %149 = shalt.err (!%p146_p10)
}
  0x19   :  { %s150_s30 = scalar_lea.vmem %s27_s12, 64  ;;  %p155_p12 = scmp.lt.s32.totalorder %s27_s12, %s27_s12 }
  0x1a   :  { %p151_p11 = scmp.ne.s32.totalorder %s27_s12, %s150_s30  ;;  %p156_p13 = scmp.lt.s32.totalorder %s150_s30, %s150_s30 }
  0x1c   :  { %p157_p0 = por %p156_p13, %p155_p12 }
  0x1e   :  { %p158_p1 = pnand %p157_p0, %p151_p11 }
  0x20   :  { %161 = shalt.err (!%p158_p1)
}
  0x21   :  { %29 = dma.hbm_to_vmem [thread:$0]  %s247_s1, 64, %s27_s12, [#allocation6]  }
  0x22   :  { %184 = dma.done.wait [#allocation3], 64  }
  0x23   :  { %185 = vsyncadd [#allocation3], 4294967232 }
  0x24   :  { %186 = dma.done.wait [#allocation6], 64  }
  0x25   :  { %187 = vsyncadd [#allocation6], 4294967232  ;;  %v192_v0 = vmov 0.0   ;;  %vm193_vm0 = vmmov 0   ;;  %vm43_vm1 = vcmask 1043456   ;;  %vm39_vm2 = vcmask 64512  }
  0x26   :  { %107 = vmatprep.subr.bf16.mxu0 %v192_v0  ;;  %109 = vmatprep.mubr.msk.bf16.mxu0 %vm193_vm0, %v192_v0  ;;  %v38_v1 = vld [vmem:[#allocation5] sm:$0xf]  ;;  %v37_v3 = vld [vmem:[#allocation2] sm:$0xf]  ;;  %s194_s4 = smov [#allocation7]  }
  0x27   :  { %v45_v2 = vsel %vm43_vm1, %v38_v1, 0  ;;  %s94_s5 = sshll.u32 %s194_s4, 4  ;;  %s95_s5 = int_to_ptr.vmem [resolvable:$true] %s94_s5 }
  0x28   :  { %108 = vmatpush3.bf16.msra.mxu0 %v45_v2  ;;  %s162_s1 = scalar_lea.vmem %s95_s5, 128  ;;  %p167_p3 = scmp.lt.s32.totalorder %s95_s5, %s95_s5 }
  0x29   :  { %p163_p2 = scmp.ne.s32.totalorder %s95_s5, %s162_s1  ;;  %p168_p4 = scmp.lt.s32.totalorder %s162_s1, %s162_s1 }
  0x2b   :  { %110 = vmatmul.mubr.msk.bf16.vlgmr.msra.gmra.mrb[0].mxu0 %vm39_vm2, %v37_v3  ;;  %p169_p5 = por %p168_p4, %p167_p3 }
  0x2d   :  { %p170_p6 = pnand %p169_p5, %p163_p2 }
  0xfe   :  { %v81_v4 = vpop.f32.mrb[0].mxu0 }
  0xff   :  { %87 = vst [vmem:[#allocation7] sm:$0xff] %v81_v4  ;;  %v111_v5 = vpop.f32.mrb[1].mxu0 }
 0x100   :  { %v84_v6 = vpop.f32.mrb[2].mxu0 }
 0x101   :  { %173 = shalt.err (!%p170_p6)
}
 0x102   :  { %s174_s8 = scalar_lea.hbm %s248_s2, 128 }
 0x103   :  { %p175_p7 = scmp.ne.s32.totalorder %s248_s2, %s174_s8  ;;  %p178_p8 = scmp.lt.u32.totalorder %s174_s8, %s248_s2 }
 0x105   :  { %p180_p9 = pnand %p178_p8, %p175_p7 }
 0x107   :  { %183 = shalt.err (!%p180_p9)
}
 0x108   :  { %97 = dma.vmem_to_hbm [thread:$0]  %s95_s5, 128, %s248_s2, [#allocation4]   ;;  %v112_v7 = vpop.f32.mrb[3].mxu0 }
 0x109   :  { %188 = dma.done.wait [#allocation4], 128  }
 0x10a   :  { %189 = vsyncadd [#allocation4], 4294967168 }
 0x10b   :  { %101 = vsyncpa [#allocation3], 1 }
 0x10c   :  { %102 = vsyncpa [#allocation6], 1 }
 0x10d   :  { %103 = vsyncpa [#allocation4], 1 }

</bundles_post_ra>
